<compile_context>
chip_gen: v6e
topology: v6e:2x2x1
jax: 0.10.0
libtpu: 0.0.40
codegen_flags: <defaults>
</compile_context>

<pallas_src>
import functools

import jax
import jax.numpy as jnp
from jax import lax
from jax.experimental import pallas as pl
from jax.experimental.pallas import tpu as pltpu

BN_EPS = 1e-5
CP = 128  # lane-padded output-channel count (Cout=64 -> 128 lanes)


# ----------------------------- Pallas kernel ---------------------------------

def _stem_kernel(p_ref, w_ref, s_ref, o_ref, row_scr, *, ho, wo):
    """conv1 (im2col GEMM, BN folded) + ReLU + fused 3x3/stride-2/pad-1 max-pool.

    p_ref : (ho*wo, KP)      im2col patches for one image (K zero-padded to KP)
    w_ref : (KP, CP)         BN-folded weights, Cout zero-padded to CP=128
    s_ref : (1, CP)          BN shift (beta - mean*scale), zero-padded
    o_ref : (ho2*wo2, CP)    pooled output rows, lane-dense
    row_scr: (8 + ho2*wo, CP) VMEM scratch for the W-direction pooling stage
    """
    ho2, wo2 = ho // 2, wo // 2
    n_out = ho2 * wo2
    cp = o_ref.shape[-1]

    # conv + (folded) BN + ReLU
    y = jnp.dot(p_ref[...], w_ref[...], preferred_element_type=jnp.float32)
    y = jnp.maximum(y + s_ref[...], 0.0)                       # (ho*wo, cp)

    # --- H direction: output row a takes input rows {2a-1, 2a, 2a+1} -----------
    yh = y.reshape(ho2, 2 * wo, cp)                            # aligned sublane split
    ev = yh[:, :wo, :]                                         # input rows 2a
    od = yh[:, wo:, :]                                         # input rows 2a+1
    pr = jnp.concatenate(                                      # input rows 2a-1 (zero pad at a=0)
        [jnp.zeros((1, wo, cp), jnp.float32), od[:-1]], axis=0)
    rowmax = jnp.maximum(jnp.maximum(ev, od), pr)              # (ho2, wo, cp)

    # --- W direction: stage in VMEM, read the 3 taps via stride-2 sublane reads.
    row_scr[pl.ds(0, 8), :] = jnp.zeros((8, cp), jnp.float32)  # zero prefix (tile-aligned)
    row_scr[pl.ds(8, ho2 * wo), :] = rowmax.reshape(ho2 * wo, cp)
    ew = row_scr[pl.ds(8, n_out, stride=2), :]                 # cols 2b
    ow = row_scr[pl.ds(9, n_out, stride=2), :]                 # cols 2b+1
    pw = row_scr[pl.ds(7, n_out, stride=2), :]                 # cols 2b-1 (raw)
    col = lax.broadcasted_iota(jnp.int32, (n_out, cp), 0) % wo2
    pw = jnp.where(col == 0, 0.0, pw)                          # zero pad at left box edge
    o_ref[...] = jnp.maximum(jnp.maximum(ew, ow), pw)          # lane-dense store (cp=128)


# ----------------------------- pallas_call wrapper ----------------------------

def stem_pallas(patches, w2d, shift, *, n, ho, wo):
    m_img = ho * wo
    kp = patches.shape[1]
    ho2, wo2 = ho // 2, wo // 2
    n_out = ho2 * wo2
    kernel = functools.partial(_stem_kernel, ho=ho, wo=wo)
    return pl.pallas_call(
        kernel,
        out_shape=jax.ShapeDtypeStruct((n * n_out, CP), jnp.float32),
        grid_spec=pltpu.PrefetchScalarGridSpec(
            num_scalar_prefetch=0,
            grid=(n,),                                   # one (big) step per image
            in_specs=[
                pl.BlockSpec((m_img, kp), lambda b: (b, 0)),
                pl.BlockSpec((kp, CP), lambda b: (0, 0)),
                pl.BlockSpec((1, CP), lambda b: (0, 0)),
            ],
            out_specs=pl.BlockSpec((n_out, CP), lambda b: (b, 0)),
            scratch_shapes=[pltpu.VMEM((8 + ho2 * wo, CP), jnp.float32)],
        ),
        compiler_params=pltpu.CompilerParams(
            dimension_semantics=("parallel",)),
    )(patches, w2d, shift)


# ----------------------------- plain-JAX glue ---------------------------------

def _im2col(x_nhwc, kh, kw, stride, pad):
    x_pad = jnp.pad(x_nhwc, ((0, 0), (pad, pad), (pad, pad), (0, 0)))
    n, hp, wp, c = x_pad.shape
    ho = (hp - kh) // stride + 1
    wo = (wp - kw) // stride + 1
    cols = []
    for ky in range(kh):
        for kx in range(kw):
            cols.append(x_pad[:, ky:ky + stride * ho:stride,
                              kx:kx + stride * wo:stride, :])
    patches = jnp.concatenate(cols, axis=-1)          # (n, ho, wo, kh*kw*c)
    return patches.reshape(n * ho * wo, kh * kw * c), (ho, wo)


def resnet18_stem_forward(x_nchw, params):
    w = params["conv1_w"]                              # (Cout, Cin, 7, 7) OIHW
    n, cin, _, _ = x_nchw.shape
    cout, _, kh, kw = w.shape

    x = jnp.transpose(x_nchw, (0, 2, 3, 1))            # NCHW -> NHWC
    patches, (ho, wo) = _im2col(x, kh, kw, stride=2, pad=3)
    k = kh * kw * cin

    # fused-pool layout assumptions (hold for 32x32 input: ho = wo = 16)
    assert ho % 2 == 0 and wo % 8 == 0 and ((ho // 2) * (wo // 2)) % 8 == 0

    # Fold BN (inference, running stats) into weights; only the shift goes in.
    scale = params["bn1_gamma"] * lax.rsqrt(params["bn1_var"] + BN_EPS)
    shift = params["bn1_beta"] - params["bn1_mean"] * scale
    w2d = jnp.transpose(w, (2, 3, 1, 0)).reshape(k, cout) * scale[None, :]

    # Lane-align: K 147 -> 256, Cout 64 -> 128 (zero padding, numerically exact).
    kp = pl.cdiv(k, 128) * 128
    patches = jnp.pad(patches, ((0, 0), (0, kp - k)))
    w2d = jnp.pad(w2d, ((0, kp - k), (0, CP - cout)))
    shift = jnp.pad(shift.reshape(1, cout), ((0, 0), (0, CP - cout)))

    ho2, wo2 = ho // 2, wo // 2
    pooled = stem_pallas(patches, w2d, shift, n=n, ho=ho, wo=wo)   # (n*ho2*wo2, 128)
    out = pooled[:, :cout].reshape(n, ho2, wo2, cout)
    return jnp.transpose(out, (0, 3, 1, 2))            # back to NCHW


# ----------------------------- reference (pure JAX) ---------------------------

def reference_forward(x, p):
    y = lax.conv_general_dilated(x, p["conv1_w"], (2, 2), [(3, 3), (3, 3)],
                                 dimension_numbers=("NCHW", "OIHW", "NCHW"),
                                 precision=lax.Precision.HIGHEST)
    scale = p["bn1_gamma"] / jnp.sqrt(p["bn1_var"] + BN_EPS)
    shift = p["bn1_beta"] - p["bn1_mean"] * scale
    y = y * scale[None, :, None, None] + shift[None, :, None, None]
    y = jnp.maximum(y, 0.0)
    y = lax.reduce_window(y, -jnp.inf, lax.max, (1, 1, 3, 3), (1, 1, 2, 2),
                          [(0, 0), (0, 0), (1, 1), (1, 1)])
    return y


# ----------------------------- main -------------------------------------------

if __name__ == "__main__":
    key = jax.random.PRNGKey(0)
    k_x, k_w, k_g, k_b, k_m, k_v = jax.random.split(key, 6)

    # Deterministic synthetic parameters (shapes match resnet18 conv1 / bn1).
    params = {
        "conv1_w":   0.05 * jax.random.normal(k_w, (64, 3, 7, 7), jnp.float32),
        "bn1_gamma": 1.0 + 0.1 * jax.random.normal(k_g, (64,), jnp.float32),
        "bn1_beta":  0.1 * jax.random.normal(k_b, (64,), jnp.float32),
        "bn1_mean":  0.1 * jax.random.normal(k_m, (64,), jnp.float32),
        "bn1_var":   1.0 + 0.1 * jnp.abs(jax.random.normal(k_v, (64,), jnp.float32)),
    }

    x = jax.random.normal(k_x, (2, 3, 32, 32), jnp.float32)   # NCHW, like PyTorch

    fwd = jax.jit(resnet18_stem_forward)
    out = jax.block_until_ready(fwd(x, params))

    assert out.shape == (2, 64, 8, 8), out.shape
    ref = reference_forward(x, params)
    assert bool(jnp.all(jnp.isfinite(out)))
    err = float(jnp.max(jnp.abs(out - ref)))
    assert jnp.allclose(out, ref, atol=2e-3, rtol=2e-3), err

    print("KERNEL_OK")
</pallas_src>

<mosaic_0001>
module attributes {stable_mosaic.version = 11 : i64} {
  func.func @_stem_kernel(%arg0: i32, %arg1: memref<256x256xf32, #tpu.memory_space<vmem>>, %arg2: memref<256x128xf32, #tpu.memory_space<vmem>>, %arg3: memref<1x128xf32, #tpu.memory_space<vmem>>, %arg4: memref<64x128xf32, #tpu.memory_space<vmem>>, %arg5: memref<136x128xf32, #tpu.memory_space<vmem>>) attributes {dimension_semantics = [#tpu.dimension_semantics<parallel>], iteration_bounds = array<i64: 2>, scalar_prefetch = 0 : i64, scratch_operands = 1 : i64, tpu.core_type = #tpu.core_type<tc>, window_params = [{transform_indices = @transform_0, window_bounds = array<i64: 256, 256>}, {pipeline_mode = #tpu.pipeline_mode<synchronous>, transform_indices = @transform_1, window_bounds = array<i64: 256, 128>}, {pipeline_mode = #tpu.pipeline_mode<synchronous>, transform_indices = @transform_2, window_bounds = array<i64: 1, 128>}, {transform_indices = @transform_3, window_bounds = array<i64: 64, 128>}]} {
    %c0 = arith.constant 0 : index
    %c0_0 = arith.constant 0 : index
    %0 = vector.load %arg1[%c0, %c0_0] : memref<256x256xf32, #tpu.memory_space<vmem>>, vector<256x256xf32>
    %c0_1 = arith.constant 0 : index
    %c0_2 = arith.constant 0 : index
    %1 = vector.load %arg2[%c0_1, %c0_2] : memref<256x128xf32, #tpu.memory_space<vmem>>, vector<256x128xf32>
    %cst = arith.constant dense<0.000000e+00> : vector<256x128xf32>
    %2 = tpu.matmul %0, %1, %cst {dimension_numbers = #tpu.dot_dimension_numbers<[1], [0], [0], [1], [0, 0, 1, 1], [], []>} : vector<256x256xf32>, vector<256x128xf32>, vector<256x128xf32> -> vector<256x128xf32>
    %c0_3 = arith.constant 0 : index
    %c0_4 = arith.constant 0 : index
    %3 = vector.load %arg3[%c0_3, %c0_4] : memref<1x128xf32, #tpu.memory_space<vmem>>, vector<1x128xf32>
    %4 = vector.broadcast %3 : vector<1x128xf32> to vector<256x128xf32>
    %5 = arith.addf %2, %4 : vector<256x128xf32>
    %cst_5 = arith.constant 0.000000e+00 : f32
    %6 = vector.broadcast %cst_5 : f32 to vector<256x128xf32>
    %7 = arith.maximumf %5, %6 : vector<256x128xf32>
    %8 = vector.shape_cast %7 : vector<256x128xf32> to vector<8x32x128xf32>
    %9 = vector.extract_strided_slice %8 {offsets = [0, 0, 0], sizes = [8, 16, 128], strides = [1, 1, 1]} : vector<8x32x128xf32> to vector<8x16x128xf32>
    %10 = vector.extract_strided_slice %8 {offsets = [0, 16, 0], sizes = [8, 16, 128], strides = [1, 1, 1]} : vector<8x32x128xf32> to vector<8x16x128xf32>
    %cst_6 = arith.constant 0.000000e+00 : f32
    %11 = vector.broadcast %cst_6 : f32 to vector<1x16x128xf32>
    %12 = vector.extract_strided_slice %10 {offsets = [0, 0, 0], sizes = [7, 16, 128], strides = [1, 1, 1]} : vector<8x16x128xf32> to vector<7x16x128xf32>
    %13 = tpu.concatenate %11, %12 in 0 : vector<1x16x128xf32>, vector<7x16x128xf32> -> vector<8x16x128xf32>
    %14 = arith.maximumf %9, %10 : vector<8x16x128xf32>
    %15 = arith.maximumf %14, %13 : vector<8x16x128xf32>
    %cst_7 = arith.constant 0.000000e+00 : f32
    %16 = vector.broadcast %cst_7 : f32 to vector<8x128xf32>
    %c0_8 = arith.constant 0 : index
    %c0_9 = arith.constant 0 : index
    %17 = vector.load %arg5[%c0_8, %c0_9] : memref<136x128xf32, #tpu.memory_space<vmem>>, vector<8x128xf32>
    tpu.vector_store %arg5[%c0_8, %c0_9], %16 {strides = array<i32>} : memref<136x128xf32, #tpu.memory_space<vmem>>, vector<8x128xf32>,
    %18 = vector.shape_cast %15 : vector<8x16x128xf32> to vector<128x128xf32>
    %c8 = arith.constant 8 : index
    %c0_10 = arith.constant 0 : index
    %19 = vector.load %arg5[%c8, %c0_10] : memref<136x128xf32, #tpu.memory_space<vmem>>, vector<128x128xf32>
    tpu.vector_store %arg5[%c8, %c0_10], %18 {strides = array<i32>} : memref<136x128xf32, #tpu.memory_space<vmem>>, vector<128x128xf32>,
    %c8_11 = arith.constant 8 : index
    %c0_12 = arith.constant 0 : index
    %20 = tpu.strided_load %arg5[%c8_11, %c0_12] {strides = array<i32: 2, 1>} : memref<136x128xf32, #tpu.memory_space<vmem>>, vector<64x128xf32>
    %c9 = arith.constant 9 : index
    %c0_13 = arith.constant 0 : index
    %21 = tpu.strided_load %arg5[%c9, %c0_13] {strides = array<i32: 2, 1>} : memref<136x128xf32, #tpu.memory_space<vmem>>, vector<64x128xf32>
    %c7 = arith.constant 7 : index
    %c0_14 = arith.constant 0 : index
    %22 = tpu.strided_load %arg5[%c7, %c0_14] {strides = array<i32: 2, 1>} : memref<136x128xf32, #tpu.memory_space<vmem>>, vector<64x128xf32>
    %23 = tpu.iota {dimensions = array<i32: 0>} : vector<64x128xi32>
    %c8_i32 = arith.constant 8 : i32
    %c0_i32 = arith.constant 0 : i32
    %24 = arith.cmpi eq, %c8_i32, %c0_i32 : i32
    %c1_i32 = arith.constant 1 : i32
    %25 = arith.select %24, %c1_i32, %c8_i32 : i32
    %26 = vector.broadcast %25 : i32 to vector<64x128xi32>
    %27 = arith.remsi %23, %26 : vector<64x128xi32>
    %c0_i32_15 = arith.constant 0 : i32
    %28 = vector.broadcast %c0_i32_15 : i32 to vector<64x128xi32>
    %29 = arith.cmpi ne, %27, %28 : vector<64x128xi32>
    %c0_i32_16 = arith.constant 0 : i32
    %30 = vector.broadcast %c0_i32_16 : i32 to vector<64x128xi32>
    %31 = arith.cmpi slt, %27, %30 : vector<64x128xi32>
    %c0_i32_17 = arith.constant 0 : i32
    %32 = arith.cmpi slt, %25, %c0_i32_17 : i32
    %33 = vector.broadcast %32 : i1 to vector<64x128xi1>
    %34 = vector.broadcast %33 : vector<64x128xi1> to vector<64x128xi1>
    %35 = arith.xori %31, %34 : vector<64x128xi1>
    %36 = arith.andi %35, %29 : vector<64x128xi1>
    %37 = vector.broadcast %25 : i32 to vector<64x128xi32>
    %38 = arith.addi %27, %37 : vector<64x128xi32>
    %39 = arith.select %36, %38, %27 : vector<64x128xi1>, vector<64x128xi32>
    %c0_i32_18 = arith.constant 0 : i32
    %40 = vector.broadcast %c0_i32_18 : i32 to vector<64x128xi32>
    %41 = arith.cmpi eq, %39, %40 : vector<64x128xi32>
    %cst_19 = arith.constant 0.000000e+00 : f32
    %42 = vector.broadcast %cst_19 : f32 to vector<64x128xf32>
    %43 = arith.select %41, %42, %22 : vector<64x128xi1>, vector<64x128xf32>
    %44 = arith.maximumf %20, %21 : vector<64x128xf32>
    %45 = arith.maximumf %44, %43 : vector<64x128xf32>
    %c0_20 = arith.constant 0 : index
    %c0_21 = arith.constant 0 : index
    %46 = vector.load %arg4[%c0_20, %c0_21] : memref<64x128xf32, #tpu.memory_space<vmem>>, vector<64x128xf32>
    tpu.vector_store %arg4[%c0_20, %c0_21], %45 {strides = array<i32>} : memref<64x128xf32, #tpu.memory_space<vmem>>, vector<64x128xf32>,
    return
  }
  func.func @transform_0(%arg0: i32) -> (i32, i32) {
    %c0_i32 = arith.constant 0 : i32
    %c0_i32_0 = arith.constant 0 : i32
    return %arg0, %c0_i32 : i32, i32
  }
  func.func @transform_1(%arg0: i32) -> (i32, i32) {
    %c0_i32 = arith.constant 0 : i32
    %c0_i32_0 = arith.constant 0 : i32
    %c0_i32_1 = arith.constant 0 : i32
    return %c0_i32, %c0_i32_0 : i32, i32
  }
  func.func @transform_2(%arg0: i32) -> (i32, i32) {
    %c0_i32 = arith.constant 0 : i32
    %c0_i32_0 = arith.constant 0 : i32
    %c0_i32_1 = arith.constant 0 : i32
    return %c0_i32, %c0_i32_0 : i32, i32
  }
  func.func @transform_3(%arg0: i32) -> (i32, i32) {
    %c0_i32 = arith.constant 0 : i32
    %c0_i32_0 = arith.constant 0 : i32
    return %arg0, %c0_i32 : i32, i32
  }
}

</mosaic_0001>

<bundles_post_ra>
// kernel: resnet18_stem_forward.1
= control target key start
LH: loop header
LB: loop body
LE: loop exit
PB: predicated region body
PF: predicated region fallthrough
CT: control target
= control target key end

     0   :  { %8 = vsyncpa [#allocation4], 0  ;;  %s1579_s0 = inlined_call_operand.vmem [shape: f32[512,256], index: 0, kind: input, shape index: {}]   ;;  %s1580_s1 = inlined_call_operand.vmem [shape: f32[256,128], index: 1, kind: input, shape index: {}]   ;;  %s1581_s2 = inlined_call_operand.vmem [shape: f32[1,128], index: 2, kind: input, shape index: {}]   ;;  %s1582_s3 = inlined_call_operand.hbm [shape: f32[128,128], index: 3, kind: output, shape index: {}]  }
   0x1   :  { %10 = vsyncpa [#allocation4 + $0x1], 0  ;;  %s1061_s12 = smov 0   ;;  %s1063_s13 = smov 0  }
   0x2   :  { %s1065_s14 = smov 0   ;;  %s1067_s15 = smov 0  }
   0x3 LB: > { %s1082_s16 = sadd.s32 4294967295, %s1035_s15   ;;  %s853_s17 = sadd.s32 4294967294, %s1035_s15   ;;  %s1035_s15 = sphi %s1067_s15, %s1602_s15   ;;  %s1031_s14 = sphi %s1065_s14, %s1601_s14   ;;  %s1027_s13 = sphi %s1063_s13, %s1600_s13   ;;  %s1023_s12 = sphi %s1061_s12, %s1599_s12  }
   0x4   : > { %s1086_s18 = sadd.s32 1, %s1035_s15   ;;  %s91_s19 = sadd.s32 1, %s1031_s14 }
   0x5   : > { %s88_s20 = ssub.s32 %s1035_s15, %s1086_s18  ;;  %p101_p0 = scmp.ne.s32.totalorder %s1031_s14, %s1027_s13 }
   0x6   : > { %p89_p1 = scmp.eq.s32.totalorder %s88_s20, 0  ;;  %p102_p2 = scmp.eq.s32.totalorder %s1082_s16, 1 }
   0x7   : > { %p107_p3 = scmp.ne.s32.totalorder %s1027_s13, %s1023_s12  ;;  %p108_p4 = scmp.eq.s32.totalorder %s853_s17, 1 }
   0x8   : > { %s1097_s21 = scalar_select %p89_p1, %s1031_s14, %s91_s19  }
   0x9   : > { %p1099_p5 = por %p102_p2, %p101_p0  ;;  %p1103_p6 = por %p108_p4, %p107_p3 }
   0xa   : > { %p856_p7 = scmp.ge.s32.totalorder %s1035_s15, 1  ;;  %p142_p8 = scmp.lt.s32.totalorder %s1035_s15, 3 }
   0xc   : > { %p143_p9 = pnand %p856_p7, %p142_p8 }
   0xd   : > { %s858_s9 = sshll.u32 (!%p143_p9), %s1082_s16, 5  ;;  %s164_s20 = sand.u32 (!%p143_p9), 1, %s1027_s13  }
   0xe   : > { %146 = sbr.rel (%p143_p9) target bundleno = 375 (0x177), region = 32  ;;  %p168_p10 = scmp.lt.s32.totalorder (!%p143_p9), %s858_s9, 63 }
   0xf   : > { %s857_s24 = sshll.u32 (!%p143_p9), %s164_s20, 6  ;;  %s868_s26 = sshll.u32 (!%p143_p9), %s1082_s16, 10 }
  0x10   : > { %s1406_s25 = scalar_lea.vmem (!%p143_p9), [#allocation3], %s857_s24  ;;  %s1539_s30 = scalar_lea.sflag (!%p143_p9), [#allocation4], %s164_s20 }
  0x11   : > { %s791_s27 = sshll.u32 (!%p143_p9), %s1406_s25, 4  ;;  %s1038_s5 = smov (!%p143_p9), [#allocation3]   ;;  %s1532_s27 = int_to_ptr.vmem [resolvable:$true] %s791_s27 }
  0x12   : > { %s975_s4 = scalar_lea.vmem (!%p143_p9), %s1532_s27, 1024  ;;  %s979_s6 = sshll.u32 (!%p143_p9), %s1038_s5, 4  ;;  %s980_s6 = int_to_ptr.vmem [resolvable:$false] %s979_s6 }
  0x13   : > { %v254_v0 = vld [vmem:[%s1580_s1 + $0x78] sm:$0xff]  ;;  %v1037_v1 = vmov 0.0   ;;  %v253_v2 = vld [vmem:[%s1580_s1 + $0x70] sm:$0xff]  ;;  %v252_v3 = vld [vmem:[%s1580_s1 + $0x68] sm:$0xff]  ;;  %s1604_s9 = smov (!%p168_p10, %s858_s9), 63  ;;  %p976_p11 = scmp.ne.s32.totalorder %s1532_s27, %s975_s4 }
  0x14   : > { %278 = vmatprep.subr.mxu0 %v1037_v1  ;;  %567 = vst [vmem:[#allocation2] sm:$0xff] %v1037_v1  ;;  %869 = vmatprep.subr.mxu1 %v1037_v1  ;;  %v251_v4 = vld [vmem:[%s1580_s1 + $0x60] sm:$0xff]  ;;  %v250_v5 = vld [vmem:[%s1580_s1 + $0x58] sm:$0xff]  ;;  %v249_v6 = vld [vmem:[%s1580_s1 + $0x50] sm:$0xff]  ;;  %s867_s29 = sshll.u32 %s1604_s9, 4  ;;  %s981_s7 = scalar_lea.vmem %s980_s6, 2048 }
  0x15   : > { %279 = vmatpush1.msra.mxu0 %v254_v0  ;;  %901 = vmatpush1.msra.mxu1 %v254_v0  ;;  %v248_v7 = vld [vmem:[%s1580_s1 + $0x48] sm:$0xff]  ;;  %v247_v8 = vld [vmem:[%s1580_s1 + $0x40] sm:$0xff]  ;;  %v246_v9 = vld [vmem:[%s1580_s1 + $0x38] sm:$0xff]  ;;  %s1267_s9 = scalar_lea.vmem %s1579_s0, %s867_s29  ;;  %s1530_s29 = scalar_lea.hbm %s1582_s3, %s868_s26 }
  0x16   : > { %280 = vmatprep.subr.mxu0 %v1037_v1  ;;  %870 = vmatprep.subr.mxu1 %v1037_v1  ;;  %v245_v10 = vld [vmem:[%s1580_s1 + $0x30] sm:$0xff]  ;;  %v244_v11 = vld [vmem:[%s1580_s1 + $0x28] sm:$0xff]  ;;  %v243_v12 = vld [vmem:[%s1580_s1 + $0x20] sm:$0xff]  ;;  %p977_p12 = pnand %p976_p11, %p1099_p5  ;;  %p982_p0 = scmp.lt.s32.totalorder %s1532_s27, %s980_s6 }
  0x17   : > { %281 = vmatpush1.msra.mxu0 %v253_v2  ;;  %902 = vmatpush1.msra.mxu1 %v253_v2  ;;  %v242_v13 = vld [vmem:[%s1580_s1 + $0x18] sm:$0xff]  ;;  %v241_v14 = vld [vmem:[%s1580_s1 + $0x10] sm:$0xff]  ;;  %v240_v15 = vld [vmem:[%s1580_s1 + $0x8] sm:$0xff]  ;;  %p983_p1 = scmp.lt.s32.totalorder %s981_s7, %s975_s4 }
  0x18   : > { %282 = vmatprep.subr.mxu0 %v1037_v1  ;;  %871 = vmatprep.subr.mxu1 %v1037_v1  ;;  %v239_v16 = vld [vmem:[%s1580_s1] sm:$0xff]  ;;  %v270_v17 = vld [vmem:[%s1580_s1 + $0xf8] sm:$0xff]  ;;  %v269_v18 = vld [vmem:[%s1580_s1 + $0xf0] sm:$0xff]  ;;  %p978_p13 = pneg %p977_p12 }
  0x19   : > { %283 = vmatpush1.msra.mxu0 %v252_v3  ;;  %903 = vmatpush1.msra.mxu1 %v252_v3  ;;  %v268_v19 = vld [vmem:[%s1580_s1 + $0xe8] sm:$0xff]  ;;  %v267_v20 = vld [vmem:[%s1580_s1 + $0xe0] sm:$0xff]  ;;  %v266_v21 = vld [vmem:[%s1580_s1 + $0xd8] sm:$0xff]  ;;  %p984_p2 = por %p983_p1, %p982_p0 }
  0x1a   : > { %284 = vmatprep.subr.mxu0 %v1037_v1  ;;  %872 = vmatprep.subr.mxu1 %v1037_v1  ;;  %v265_v22 = vld [vmem:[%s1580_s1 + $0xd0] sm:$0xff]  ;;  %v264_v23 = vld [vmem:[%s1580_s1 + $0xc8] sm:$0xff]  ;;  %v263_v24 = vld [vmem:[%s1580_s1 + $0xc0] sm:$0xff] }
  0x1b   : > { %285 = vmatpush1.msra.mxu0 %v251_v4  ;;  %904 = vmatpush1.msra.mxu1 %v251_v4  ;;  %v262_v25 = vld [vmem:[%s1580_s1 + $0xb8] sm:$0xff]  ;;  %v261_v26 = vld [vmem:[%s1580_s1 + $0xb0] sm:$0xff]  ;;  %v260_v27 = vld [vmem:[%s1580_s1 + $0xa8] sm:$0xff]  ;;  %p985_p3 = pnand %p984_p2, %p978_p13 }
  0x1c   : > { %286 = vmatprep.subr.mxu0 %v1037_v1  ;;  %873 = vmatprep.subr.mxu1 %v1037_v1  ;;  %v259_v28 = vld [vmem:[%s1580_s1 + $0xa0] sm:$0xff]  ;;  %v258_v29 = vld [vmem:[%s1580_s1 + $0x98] sm:$0xff]  ;;  %v257_v30 = vld [vmem:[%s1580_s1 + $0x90] sm:$0xff] }
  0x1d   : > { %287 = vmatpush1.msra.mxu0 %v250_v5  ;;  %905 = vmatpush1.msra.mxu1 %v250_v5  ;;  %v256_v31 = vld [vmem:[%s1580_s1 + $0x88] sm:$0xff]  ;;  %v255_v32 = vld [vmem:[%s1580_s1 + $0x80] sm:$0xff]  ;;  %v178_v37 = vld [vmem:[%s1267_s9 + $0x18] sm:$0xff] }
  0x1e   : > { %288 = vmatprep.subr.mxu0 %v1037_v1  ;;  %874 = vmatprep.subr.mxu1 %v1037_v1  ;;  %v176_v33 = vld [vmem:[%s1267_s9 + $0x8] sm:$0xff]  ;;  %v175_v35 = vld [vmem:[%s1267_s9] sm:$0xff]  ;;  %v210_v38 = vld [vmem:[%s1267_s9 + $0x118] sm:$0xff] }
  0x1f   : > { %289 = vmatpush1.msra.mxu0 %v249_v6  ;;  %906 = vmatpush1.msra.mxu1 %v249_v6  ;;  %v208_v34 = vld [vmem:[%s1267_s9 + $0x108] sm:$0xff]  ;;  %v207_v36 = vld [vmem:[%s1267_s9 + $0x100] sm:$0xff]  ;;  %v177_v39 = vld [vmem:[%s1267_s9 + $0x10] sm:$0xff] }
  0x20   : > { %290 = vmatprep.subr.mxu0 %v1037_v1  ;;  %875 = vmatprep.subr.mxu1 %v1037_v1  ;;  %v209_v40 = vld [vmem:[%s1267_s9 + $0x110] sm:$0xff]  ;;  %v180_v41 = vld [vmem:[%s1267_s9 + $0x28] sm:$0xff]  ;;  %v179_v43 = vld [vmem:[%s1267_s9 + $0x20] sm:$0xff] }
  0x21   : > { %291 = vmatpush1.msra.mxu0 %v248_v7  ;;  %907 = vmatpush1.msra.mxu1 %v248_v7  ;;  %v212_v42 = vld [vmem:[%s1267_s9 + $0x128] sm:$0xff]  ;;  %v211_v44 = vld [vmem:[%s1267_s9 + $0x120] sm:$0xff]  ;;  %v182_v45 = vld [vmem:[%s1267_s9 + $0x38] sm:$0xff] }
  0x22   : > { %292 = vmatprep.subr.mxu0 %v1037_v1  ;;  %876 = vmatprep.subr.mxu1 %v1037_v1  ;;  %v214_v46 = vld [vmem:[%s1267_s9 + $0x138] sm:$0xff]  ;;  %v181_v47 = vld [vmem:[%s1267_s9 + $0x30] sm:$0xff]  ;;  %v184_v49 = vld [vmem:[%s1267_s9 + $0x48] sm:$0xff] }
  0x23   : > { %293 = vmatpush1.msra.mxu0 %v247_v8  ;;  %908 = vmatpush1.msra.mxu1 %v247_v8  ;;  %v213_v48 = vld [vmem:[%s1267_s9 + $0x130] sm:$0xff]  ;;  %v216_v50 = vld [vmem:[%s1267_s9 + $0x148] sm:$0xff]  ;;  %v183_v51 = vld [vmem:[%s1267_s9 + $0x40] sm:$0xff] }
  0x24   : > { %294 = vmatprep.subr.mxu0 %v1037_v1  ;;  %877 = vmatprep.subr.mxu1 %v1037_v1  ;;  %v215_v52 = vld [vmem:[%s1267_s9 + $0x140] sm:$0xff]  ;;  %v186_v53 = vld [vmem:[%s1267_s9 + $0x58] sm:$0xff]  ;;  %v185_v55 = vld [vmem:[%s1267_s9 + $0x50] sm:$0xff] }
  0x25   : > { %295 = vmatpush1.msra.mxu0 %v246_v9  ;;  %909 = vmatpush1.msra.mxu1 %v246_v9  ;;  %v218_v54 = vld [vmem:[%s1267_s9 + $0x158] sm:$0xff]  ;;  %v217_v56 = vld [vmem:[%s1267_s9 + $0x150] sm:$0xff]  ;;  %v188_v57 = vld [vmem:[%s1267_s9 + $0x68] sm:$0xff] }
  0x26   : > { %296 = vmatprep.subr.mxu0 %v1037_v1  ;;  %878 = vmatprep.subr.mxu1 %v1037_v1  ;;  %v220_v58 = vld [vmem:[%s1267_s9 + $0x168] sm:$0xff]  ;;  %v187_v59 = vld [vmem:[%s1267_s9 + $0x60] sm:$0xff]  ;;  %v190_v61 = vld [vmem:[%s1267_s9 + $0x78] sm:$0xff] }
  0x27   : > { %297 = vmatpush1.msra.mxu0 %v245_v10  ;;  %910 = vmatpush1.msra.mxu1 %v245_v10  ;;  %v219_v60 = vld [vmem:[%s1267_s9 + $0x160] sm:$0xff]  ;;  %v222_v62 = vld [vmem:[%s1267_s9 + $0x178] sm:$0xff]  ;;  %v189_v63 = vld [vmem:[%s1267_s9 + $0x70] sm:$0xff] }
  0x28   : > { %298 = vmatprep.subr.mxu0 %v1037_v1  ;;  %879 = vmatprep.subr.mxu1 %v1037_v1  ;;  %v221_v0 = vld [vmem:[%s1267_s9 + $0x170] sm:$0xff]  ;;  %v224_v2 = vld [vmem:[%s1267_s9 + $0x188] sm:$0xff]  ;;  %v191_v3 = vld [vmem:[%s1267_s9 + $0x80] sm:$0xff] }
  0x29   : > { %299 = vmatpush1.msra.mxu0 %v244_v11  ;;  %911 = vmatpush1.msra.mxu1 %v244_v11  ;;  %v223_v4 = vld [vmem:[%s1267_s9 + $0x180] sm:$0xff]  ;;  %v194_v5 = vld [vmem:[%s1267_s9 + $0x98] sm:$0xff]  ;;  %v193_v7 = vld [vmem:[%s1267_s9 + $0x90] sm:$0xff] }
  0x2a   : > { %300 = vmatprep.subr.mxu0 %v1037_v1  ;;  %880 = vmatprep.subr.mxu1 %v1037_v1  ;;  %v226_v6 = vld [vmem:[%s1267_s9 + $0x198] sm:$0xff]  ;;  %v225_v8 = vld [vmem:[%s1267_s9 + $0x190] sm:$0xff]  ;;  %v196_v9 = vld [vmem:[%s1267_s9 + $0xa8] sm:$0xff] }
  0x2b   : > { %301 = vmatpush1.msra.mxu0 %v243_v12  ;;  %912 = vmatpush1.msra.mxu1 %v243_v12  ;;  %v228_v10 = vld [vmem:[%s1267_s9 + $0x1a8] sm:$0xff]  ;;  %v195_v11 = vld [vmem:[%s1267_s9 + $0xa0] sm:$0xff] }
  0x2c   : > { %302 = vmatprep.subr.mxu0 %v1037_v1  ;;  %881 = vmatprep.subr.mxu1 %v1037_v1  ;;  %v227_v12 = vld [vmem:[%s1267_s9 + $0x1a0] sm:$0xff] }
  0x2d   : > { %303 = vmatpush1.msra.mxu0 %v242_v13  ;;  %913 = vmatpush1.msra.mxu1 %v242_v13  ;;  %v198_v13 = vld [vmem:[%s1267_s9 + $0xb8] sm:$0xff] }
  0x2e   : > { %304 = vmatprep.subr.mxu0 %v1037_v1  ;;  %882 = vmatprep.subr.mxu1 %v1037_v1 }
  0x2f   : > { %305 = vmatpush1.msra.mxu0 %v241_v14  ;;  %914 = vmatpush1.msra.mxu1 %v241_v14  ;;  %v230_v14 = vld [vmem:[%s1267_s9 + $0x1b8] sm:$0xff] }
  0x30   : > { %306 = vmatprep.subr.mxu0 %v1037_v1  ;;  %883 = vmatprep.subr.mxu1 %v1037_v1 }
  0x31   : > { %307 = vmatpush1.msra.mxu0 %v240_v15  ;;  %915 = vmatpush1.msra.mxu1 %v240_v15  ;;  %v197_v15 = vld [vmem:[%s1267_s9 + $0xb0] sm:$0xff] }
  0x32   : > { %308 = vmatprep.subr.mxu0 %v1037_v1  ;;  %884 = vmatprep.subr.mxu1 %v1037_v1 }
  0x33   : > { %309 = vmatpush1.msra.mxu0 %v239_v16  ;;  %916 = vmatpush1.msra.mxu1 %v239_v16  ;;  %v229_v16 = vld [vmem:[%s1267_s9 + $0x1b0] sm:$0xff] }
  0x34   : > { %310 = vmatprep.subr.mxu0 %v1037_v1  ;;  %885 = vmatprep.subr.mxu1 %v1037_v1 }
  0x35   : > { %311 = vmatpush2.msra.mxu0 %v270_v17  ;;  %917 = vmatpush2.msra.mxu1 %v270_v17  ;;  %v200_v17 = vld [vmem:[%s1267_s9 + $0xc8] sm:$0xff] }
  0x36   : > { %312 = vmatprep.subr.mxu0 %v1037_v1  ;;  %886 = vmatprep.subr.mxu1 %v1037_v1 }
  0x37   : > { %313 = vmatpush2.msra.mxu0 %v269_v18  ;;  %918 = vmatpush2.msra.mxu1 %v269_v18  ;;  %v232_v18 = vld [vmem:[%s1267_s9 + $0x1c8] sm:$0xff] }
  0x38   : > { %314 = vmatprep.subr.mxu0 %v1037_v1  ;;  %887 = vmatprep.subr.mxu1 %v1037_v1 }
  0x39   : > { %315 = vmatpush2.msra.mxu0 %v268_v19  ;;  %919 = vmatpush2.msra.mxu1 %v268_v19  ;;  %v199_v19 = vld [vmem:[%s1267_s9 + $0xc0] sm:$0xff] }
  0x3a   : > { %316 = vmatprep.subr.mxu0 %v1037_v1  ;;  %888 = vmatprep.subr.mxu1 %v1037_v1 }
  0x3b   : > { %317 = vmatpush2.msra.mxu0 %v267_v20  ;;  %920 = vmatpush2.msra.mxu1 %v267_v20  ;;  %v231_v20 = vld [vmem:[%s1267_s9 + $0x1c0] sm:$0xff] }
  0x3c   : > { %318 = vmatprep.subr.mxu0 %v1037_v1  ;;  %889 = vmatprep.subr.mxu1 %v1037_v1 }
  0x3d   : > { %319 = vmatpush2.msra.mxu0 %v266_v21  ;;  %921 = vmatpush2.msra.mxu1 %v266_v21  ;;  %v202_v21 = vld [vmem:[%s1267_s9 + $0xd8] sm:$0xff] }
  0x3e   : > { %320 = vmatprep.subr.mxu0 %v1037_v1  ;;  %890 = vmatprep.subr.mxu1 %v1037_v1 }
  0x3f   : > { %321 = vmatpush2.msra.mxu0 %v265_v22  ;;  %922 = vmatpush2.msra.mxu1 %v265_v22  ;;  %v234_v22 = vld [vmem:[%s1267_s9 + $0x1d8] sm:$0xff] }
  0x40   : > { %322 = vmatprep.subr.mxu0 %v1037_v1  ;;  %891 = vmatprep.subr.mxu1 %v1037_v1 }
  0x41   : > { %323 = vmatpush2.msra.mxu0 %v264_v23  ;;  %923 = vmatpush2.msra.mxu1 %v264_v23  ;;  %v201_v23 = vld [vmem:[%s1267_s9 + $0xd0] sm:$0xff] }
  0x42   : > { %324 = vmatprep.subr.mxu0 %v1037_v1  ;;  %892 = vmatprep.subr.mxu1 %v1037_v1 }
  0x43   : > { %325 = vmatpush2.msra.mxu0 %v263_v24  ;;  %924 = vmatpush2.msra.mxu1 %v263_v24  ;;  %v233_v24 = vld [vmem:[%s1267_s9 + $0x1d0] sm:$0xff] }
  0x44   : > { %326 = vmatprep.subr.mxu0 %v1037_v1  ;;  %893 = vmatprep.subr.mxu1 %v1037_v1 }
  0x45   : > { %327 = vmatpush2.msra.mxu0 %v262_v25  ;;  %925 = vmatpush2.msra.mxu1 %v262_v25  ;;  %v204_v25 = vld [vmem:[%s1267_s9 + $0xe8] sm:$0xff] }
  0x46   : > { %328 = vmatprep.subr.mxu0 %v1037_v1  ;;  %894 = vmatprep.subr.mxu1 %v1037_v1 }
  0x47   : > { %329 = vmatpush2.msra.mxu0 %v261_v26  ;;  %926 = vmatpush2.msra.mxu1 %v261_v26  ;;  %v236_v26 = vld [vmem:[%s1267_s9 + $0x1e8] sm:$0xff] }
  0x48   : > { %330 = vmatprep.subr.mxu0 %v1037_v1  ;;  %895 = vmatprep.subr.mxu1 %v1037_v1 }
  0x49   : > { %331 = vmatpush2.msra.mxu0 %v260_v27  ;;  %927 = vmatpush2.msra.mxu1 %v260_v27  ;;  %v203_v27 = vld [vmem:[%s1267_s9 + $0xe0] sm:$0xff] }
  0x4a   : > { %332 = vmatprep.subr.mxu0 %v1037_v1  ;;  %896 = vmatprep.subr.mxu1 %v1037_v1 }
  0x4b   : > { %333 = vmatpush2.msra.mxu0 %v259_v28  ;;  %928 = vmatpush2.msra.mxu1 %v259_v28  ;;  %v235_v28 = vld [vmem:[%s1267_s9 + $0x1e0] sm:$0xff] }
  0x4c   : > { %334 = vmatprep.subr.mxu0 %v1037_v1  ;;  %897 = vmatprep.subr.mxu1 %v1037_v1 }
  0x4d   : > { %335 = vmatpush2.msra.mxu0 %v258_v29  ;;  %929 = vmatpush2.msra.mxu1 %v258_v29  ;;  %v206_v29 = vld [vmem:[%s1267_s9 + $0xf8] sm:$0xff] }
  0x4e   : > { %336 = vmatprep.subr.mxu0 %v1037_v1  ;;  %898 = vmatprep.subr.mxu1 %v1037_v1 }
  0x4f   : > { %337 = vmatpush2.msra.mxu0 %v257_v30  ;;  %930 = vmatpush2.msra.mxu1 %v257_v30  ;;  %v238_v30 = vld [vmem:[%s1267_s9 + $0x1f8] sm:$0xff] }
  0x50   : > { %338 = vmatprep.subr.mxu0 %v1037_v1  ;;  %899 = vmatprep.subr.mxu1 %v1037_v1 }
  0x51   : > { %339 = vmatpush2.msra.mxu0 %v256_v31  ;;  %931 = vmatpush2.msra.mxu1 %v256_v31  ;;  %v205_v31 = vld [vmem:[%s1267_s9 + $0xf0] sm:$0xff] }
  0x52   : > { %340 = vmatprep.subr.mxu0 %v1037_v1  ;;  %900 = vmatprep.subr.mxu1 %v1037_v1  ;;  %v192_v1 = vld [vmem:[%s1267_s9 + $0x88] sm:$0xff] }
  0x53   : > { %341 = vmatpush2.msra.mxu0 %v255_v32  ;;  %932 = vmatpush2.msra.mxu1 %v255_v32  ;;  %v237_v32 = vld [vmem:[%s1267_s9 + $0x1f0] sm:$0xff] }
  0x54   : > { %342 = vmatprep.mubr.f32.mxu0 %v176_v33  ;;  %422 = vmatprep.mubr.f32.mxu1 %v208_v34 }
  0x55   : > { %343 = vmatmul.mubr.f32.vlgmr.msra.gmra.mxu0 %v175_v35  ;;  %423 = vmatmul.mubr.f32.vlgmr.msra.gmra.mxu1 %v207_v36 }
  0x56   : > { %347 = vmatprep.mubr.f32.mxu0 %v178_v37  ;;  %427 = vmatprep.mubr.f32.mxu1 %v210_v38  ;;  %v1345_v37 = vld [vmem:[%s1581_s2] ss:$0 sm:$0xff] }
  0x59   : > { %348 = vmatmul.mubr.f32.gmra.mxu0 %v177_v39  ;;  %428 = vmatmul.mubr.f32.gmra.mxu1 %v209_v40 }
  0x5a   : > { %352 = vmatprep.mubr.f32.mxu0 %v180_v41  ;;  %432 = vmatprep.mubr.f32.mxu1 %v212_v42 }
  0x5d   : > { %353 = vmatmul.mubr.f32.gmra.mxu0 %v179_v43  ;;  %433 = vmatmul.mubr.f32.gmra.mxu1 %v211_v44 }
  0x5e   : > { %357 = vmatprep.mubr.f32.mxu0 %v182_v45  ;;  %437 = vmatprep.mubr.f32.mxu1 %v214_v46 }
  0x61   : > { %358 = vmatmul.mubr.f32.gmra.mxu0 %v181_v47  ;;  %438 = vmatmul.mubr.f32.gmra.mxu1 %v213_v48 }
  0x62   : > { %362 = vmatprep.mubr.f32.mxu0 %v184_v49  ;;  %442 = vmatprep.mubr.f32.mxu1 %v216_v50 }
  0x65   : > { %363 = vmatmul.mubr.f32.gmra.mxu0 %v183_v51  ;;  %443 = vmatmul.mubr.f32.gmra.mxu1 %v215_v52 }
  0x66   : > { %367 = vmatprep.mubr.f32.mxu0 %v186_v53  ;;  %447 = vmatprep.mubr.f32.mxu1 %v218_v54 }
  0x69   : > { %368 = vmatmul.mubr.f32.gmra.mxu0 %v185_v55  ;;  %448 = vmatmul.mubr.f32.gmra.mxu1 %v217_v56  ;;  %v632_v55 = vlaneseq }
  0x6a   : > { %372 = vmatprep.mubr.f32.mxu0 %v188_v57  ;;  %452 = vmatprep.mubr.f32.mxu1 %v220_v58 }
  0x6d   : > { %373 = vmatmul.mubr.f32.gmra.mxu0 %v187_v59  ;;  %453 = vmatmul.mubr.f32.gmra.mxu1 %v219_v60 }
  0x6e   : > { %377 = vmatprep.mubr.f32.mxu0 %v190_v61  ;;  %457 = vmatprep.mubr.f32.mxu1 %v222_v62 }
  0x71   : > { %378 = vmatmul.mubr.f32.gmra.mxu0 %v189_v63  ;;  %458 = vmatmul.mubr.f32.gmra.mxu1 %v221_v0  ;;  %v1361_v0 = vshrl.u32 %v632_v55, 7 }
  0x72   : > { %382 = vmatprep.mubr.f32.mxu0 %v192_v1  ;;  %462 = vmatprep.mubr.f32.mxu1 %v224_v2 }
  0x73   : > { %v634_v55 = vadd.s32 8, %v1361_v0 }
  0x75   : > { %383 = vmatmul.mubr.f32.gmra.mxu0 %v191_v3  ;;  %463 = vmatmul.mubr.f32.gmra.mxu1 %v223_v4 }
  0x76   : > { %387 = vmatprep.mubr.f32.mxu0 %v194_v5  ;;  %467 = vmatprep.mubr.f32.mxu1 %v226_v6 }
  0x79   : > { %388 = vmatmul.mubr.f32.gmra.mxu0 %v193_v7  ;;  %468 = vmatmul.mubr.f32.gmra.mxu1 %v225_v8  ;;  %v645_v7 = vand.u32 7, %v1361_v0 }
  0x7a   : > { %392 = vmatprep.mubr.f32.mxu0 %v196_v9  ;;  %472 = vmatprep.mubr.f32.mxu1 %v228_v10 }
  0x7b   : > { %vm1377_vm0 = vcmp.eq.s32.totalorder %v645_v7, 0 }
  0x7d   : > { %393 = vmatmul.mubr.f32.gmra.mxu0 %v195_v11  ;;  %473 = vmatmul.mubr.f32.gmra.mxu1 %v227_v12 }
  0x7e   : > { %397 = vmatprep.mubr.f32.mxu0 %v198_v13  ;;  %477 = vmatprep.mubr.f32.mxu1 %v230_v14 }
  0x81   : > { %398 = vmatmul.mubr.f32.gmra.mxu0 %v197_v15  ;;  %478 = vmatmul.mubr.f32.gmra.mxu1 %v229_v16 }
  0x82   : > { %402 = vmatprep.mubr.f32.mxu0 %v200_v17  ;;  %482 = vmatprep.mubr.f32.mxu1 %v232_v18 }
  0x85   : > { %403 = vmatmul.mubr.f32.gmra.mxu0 %v199_v19  ;;  %483 = vmatmul.mubr.f32.gmra.mxu1 %v231_v20 }
  0x86   : > { %407 = vmatprep.mubr.f32.mxu0 %v202_v21  ;;  %487 = vmatprep.mubr.f32.mxu1 %v234_v22 }
  0x89   : > { %408 = vmatmul.mubr.f32.gmra.mxu0 %v201_v23  ;;  %488 = vmatmul.mubr.f32.gmra.mxu1 %v233_v24 }
  0x8a   : > { %412 = vmatprep.mubr.f32.mxu0 %v204_v25  ;;  %492 = vmatprep.mubr.f32.mxu1 %v236_v26 }
  0x8d   : > { %413 = vmatmul.mubr.f32.gmra.mxu0 %v203_v27  ;;  %493 = vmatmul.mubr.f32.gmra.mxu1 %v235_v28 }
  0x8e   : > { %417 = vmatprep.mubr.f32.mxu0 %v206_v29  ;;  %497 = vmatprep.mubr.f32.mxu1 %v238_v30 }
  0x91   : > { %418 = vmatmul.mubr.f32.gmra.mxu0 %v205_v31  ;;  %498 = vmatmul.mubr.f32.gmra.mxu1 %v237_v32 }
 0x115   : > { %v344_v33 = vpop.f32.mrf.mxu0  ;;  %v1340_v34 = vpop.f32.mrf.mxu1 }
 0x116   : > { %v345_v42 = vadd.f32 %v1345_v37, %v344_v33 }
 0x117   : > { %v346_v35 = vpop.f32.mrf.mxu0  ;;  %v426_v36 = vpop.f32.mrf.mxu1 }
 0x118   : > { %v503_v48 = vmax.f32 %v345_v42, 0.0 }
 0x119   : > { %v349_v38 = vpop.f32.mrf.mxu0  ;;  %v1347_v39 = vpop.f32.mrf.mxu1 }
 0x11a   : > { %v350_v49 = vadd.f32 %v1345_v37, %v349_v38 }
 0x11b   : > { %v351_v40 = vpop.f32.mrf.mxu0  ;;  %v431_v41 = vpop.f32.mrf.mxu1 }
 0x11c   : > { %v504_v58 = vmax.f32 %v350_v49, 0.0 }
 0x11d   : > { %v354_v43 = vpop.f32.mrf.mxu0  ;;  %v434_v44 = vpop.f32.mrf.mxu1 }
 0x11e   : > { %v1351_v45 = vadd.f32 %v1345_v37, %v354_v43  ;;  %v1364_v6 = vadd.f32 %v1345_v37, %v434_v44 }
 0x11f   : > { %v356_v46 = vpop.f32.mrf.mxu0  ;;  %v436_v47 = vpop.f32.mrf.mxu1 }
 0x120   : > { %v505_v50 = vmax.f32 %v1351_v45, 0.0  ;;  %v521_v16 = vmax.f32 %v1364_v6, 0.0 }
 0x121   : > { %v359_v51 = vpop.f32.mrf.mxu0  ;;  %v439_v52 = vpop.f32.mrf.mxu1 }
 0x122   : > { %v535_v53 = vmax.f32 %v503_v48, %v505_v50  ;;  %v1356_v54 = vadd.f32 %v1345_v37, %v359_v51  ;;  %v1394_v36 = vadd.f32 %v1345_v37, %v439_v52 }
 0x123   : > { %v361_v56 = vpop.f32.mrf.mxu0  ;;  %v441_v57 = vpop.f32.mrf.mxu1 }
 0x124   : > { %v551_v59 = vmax.f32 %v535_v53, 0.0  ;;  %v506_v60 = vmax.f32 %v1356_v54, 0.0  ;;  %v522_v53 = vmax.f32 %v1394_v36, 0.0 }
 0x125   : > { %v364_v61 = vpop.f32.mrf.mxu0  ;;  %v444_v62 = vpop.f32.mrf.mxu1 }
 0x126   : > { %568 = vst [vmem:[#allocation2 + $0x8] sm:$0xff] %v551_v59  ;;  %v536_v63 = vmax.f32 %v504_v58, %v506_v60  ;;  %v365_v10 = vadd.f32 %v1345_v37, %v364_v61  ;;  %v445_v11 = vadd.f32 %v1345_v37, %v444_v62 }
 0x127   : > { %v366_v1 = vpop.f32.mrf.mxu0  ;;  %v446_v2 = vpop.f32.mrf.mxu1 }
 0x128   : > { %v552_v3 = vmax.f32 %v536_v63, 0.0  ;;  %v507_v20 = vmax.f32 %v365_v10, 0.0  ;;  %v523_v21 = vmax.f32 %v445_v11, 0.0  ;;  %v652_v1 = vand.u32 7, %v634_v55 }
 0x129   : > { %v369_v4 = vpop.f32.mrf.mxu0  ;;  %v449_v5 = vpop.f32.mrf.mxu1 }
 0x12a   : > { %569 = vst [vmem:[#allocation2 + $0x10] sm:$0xff] %v552_v3  ;;  %v370_v27 = vadd.f32 %v1345_v37, %v369_v4  ;;  %v450_v28 = vadd.f32 %v1345_v37, %v449_v5  ;;  %vm1427_vm1 = vcmp.eq.s32.totalorder %v652_v1, 0 }
 0x12b   : > { %v371_v8 = vpop.f32.mrf.mxu0  ;;  %v451_v9 = vpop.f32.mrf.mxu1 }
 0x12c   : > { %v508_v46 = vmax.f32 %v370_v27, 0.0  ;;  %v524_v47 = vmax.f32 %v450_v28, 0.0 }
 0x12d   : > { %v374_v12 = vpop.f32.mrf.mxu0  ;;  %v454_v13 = vpop.f32.mrf.mxu1 }
 0x12e   : > { %v1371_v14 = vadd.f32 %v1345_v37, %v374_v12  ;;  %v1374_v15 = vadd.f32 %v1345_v37, %v454_v13 }
 0x12f   : > { %v376_v18 = vpop.f32.mrf.mxu0  ;;  %v456_v19 = vpop.f32.mrf.mxu1 }
 0x130   : > { %v509_v22 = vmax.f32 %v1371_v14, 0.0  ;;  %v525_v23 = vmax.f32 %v1374_v15, 0.0  ;;  %v639_v14 = vadd.s32 48, %v1361_v0 }
 0x131   : > { %v585_v24 = vld [vmem:[#allocation2 + $0x8] ss:$2 sm:$0xff]  ;;  %v601_v25 = vld [vmem:[#allocation2 + $0x9] ss:$2 sm:$0xff]  ;;  %v379_v29 = vpop.f32.mrf.mxu0  ;;  %v459_v30 = vpop.f32.mrf.mxu1 }
 0x132   : > { %v617_v26 = vld [vmem:[#allocation2 + $0x7] ss:$2 sm:$0xff]  ;;  %v753_v32 = vmax.f32 %v585_v24, %v601_v25  ;;  %v537_v33 = vmax.f32 %v507_v20, %v509_v22  ;;  %v545_v35 = vmax.f32 %v523_v21, %v525_v23  ;;  %v1397_v38 = vadd.f32 %v1345_v37, %v379_v29 }
 0x133   : > { %v745_v31 = vsel %vm1377_vm0, 0.0, %v617_v26  ;;  %v1400_v40 = vadd.f32 %v1345_v37, %v459_v30  ;;  %v381_v41 = vpop.f32.mrf.mxu0  ;;  %v461_v42 = vpop.f32.mrf.mxu1  ;;  %v687_v1 = vand.u32 7, %v639_v14 }
 0x134   : > { %v761_v43 = vmax.f32 %v753_v32, %v745_v31  ;;  %v553_v44 = vmax.f32 %v537_v33, %v505_v50  ;;  %v561_v45 = vmax.f32 %v545_v35, %v521_v16  ;;  %v510_v48 = vmax.f32 %v1397_v38, 0.0 }
 0x135   : > { %v526_v49 = vmax.f32 %v1400_v40, 0.0  ;;  %v384_v51 = vpop.f32.mrf.mxu0  ;;  %v464_v52 = vpop.f32.mrf.mxu1  ;;  %vm1475_vm3 = vcmp.eq.s32.totalorder %v687_v1, 0 }
 0x136   : > { %769 = vst [vmem:[%s1406_s25] sm:$0xff] %v761_v43  ;;  %570 = vst [vmem:[#allocation2 + $0x18] sm:$0xff] %v553_v44  ;;  %v538_v50 = vmax.f32 %v508_v46, %v510_v48  ;;  %v385_v2 = vadd.f32 %v1345_v37, %v384_v51  ;;  %v465_v5 = vadd.f32 %v1345_v37, %v464_v52 }
 0x137   : > { %578 = vst [vmem:[#allocation2 + $0x58] sm:$0xff] %v561_v45  ;;  %v546_v56 = vmax.f32 %v524_v47, %v526_v49  ;;  %v386_v57 = vpop.f32.mrf.mxu0  ;;  %v466_v58 = vpop.f32.mrf.mxu1 }
 0x138   : > { %v554_v59 = vmax.f32 %v538_v50, %v506_v60  ;;  %v511_v10 = vmax.f32 %v385_v2, 0.0  ;;  %v527_v13 = vmax.f32 %v465_v5, 0.0  ;;  %v425_v58 = vadd.f32 %v1345_v37, %v1340_v34 }
 0x139   : > { %v562_v61 = vmax.f32 %v546_v56, %v522_v53  ;;  %v389_v62 = vpop.f32.mrf.mxu0  ;;  %v469_v63 = vpop.f32.mrf.mxu1  ;;  %v635_v56 = vadd.s32 16, %v1361_v0  ;;  %v430_v2 = vadd.f32 %v1345_v37, %v1347_v39 }
 0x13a   : > { %571 = vst [vmem:[#allocation2 + $0x20] sm:$0xff] %v554_v59  ;;  %v390_v17 = vadd.f32 %v1345_v37, %v389_v62  ;;  %v470_v20 = vadd.f32 %v1345_v37, %v469_v63  ;;  %v519_v5 = vmax.f32 %v425_v58, 0.0 }
 0x13b   : > { %579 = vst [vmem:[#allocation2 + $0x60] sm:$0xff] %v562_v61  ;;  %v391_v3 = vpop.f32.mrf.mxu0  ;;  %v471_v4 = vpop.f32.mrf.mxu1  ;;  %v659_v63 = vand.u32 7, %v635_v56 }
 0x13c   : > { %v512_v42 = vmax.f32 %v390_v17, 0.0  ;;  %v528_v47 = vmax.f32 %v470_v20, 0.0 }
 0x13d   : > { %v394_v7 = vpop.f32.mrf.mxu0  ;;  %v474_v8 = vpop.f32.mrf.mxu1  ;;  %vm1471_vm2 = vcmp.eq.s32.totalorder %v659_v63, 0  ;;  %v636_v63 = vadd.s32 24, %v1361_v0 }
 0x13e   : > { %v1422_v9 = vadd.f32 %v1345_v37, %v394_v7  ;;  %v1425_v54 = vadd.f32 %v1345_v37, %v474_v8 }
 0x13f   : > { %v396_v11 = vpop.f32.mrf.mxu0  ;;  %v476_v12 = vpop.f32.mrf.mxu1 }
 0x140   : > { %v513_v18 = vmax.f32 %v1422_v9, 0.0  ;;  %v529_v19 = vmax.f32 %v1425_v54, 0.0  ;;  %v543_v11 = vmax.f32 %v519_v5, %v521_v16  ;;  %v637_v54 = vadd.s32 32, %v1361_v0 }
 0x141   : > { %v399_v21 = vpop.f32.mrf.mxu0  ;;  %v479_v24 = vpop.f32.mrf.mxu1  ;;  %v587_v25 = vld [vmem:[#allocation2 + $0x18] ss:$2 sm:$0xff]  ;;  %v603_v26 = vld [vmem:[#allocation2 + $0x19] ss:$2 sm:$0xff] }
 0x142   : > { %v619_v27 = vld [vmem:[#allocation2 + $0x17] ss:$2 sm:$0xff]  ;;  %v539_v28 = vmax.f32 %v511_v10, %v513_v18  ;;  %v547_v29 = vmax.f32 %v527_v13, %v529_v19  ;;  %v1440_v30 = vadd.f32 %v1345_v37, %v399_v21  ;;  %v1443_v31 = vadd.f32 %v1345_v37, %v479_v24 }
 0x143   : > { %v746_v32 = vsel %vm1427_vm1, 0.0, %v619_v27  ;;  %v754_v33 = vmax.f32 %v587_v25, %v603_v26  ;;  %v401_v35 = vpop.f32.mrf.mxu0  ;;  %v481_v41 = vpop.f32.mrf.mxu1  ;;  %v520_v10 = vmax.f32 %v430_v2, 0.0 }
 0x144   : > { %v555_v43 = vmax.f32 %v539_v28, %v509_v22  ;;  %v563_v44 = vmax.f32 %v547_v29, %v525_v23  ;;  %v514_v45 = vmax.f32 %v1440_v30, 0.0  ;;  %v530_v51 = vmax.f32 %v1443_v31, 0.0 }
 0x145   : > { %v762_v46 = vmax.f32 %v754_v33, %v746_v32  ;;  %v404_v52 = vpop.f32.mrf.mxu0  ;;  %v484_v50 = vpop.f32.mrf.mxu1  ;;  %v544_v27 = vmax.f32 %v520_v10, %v522_v53 }
 0x146   : > { %572 = vst [vmem:[#allocation2 + $0x28] sm:$0xff] %v555_v43  ;;  %580 = vst [vmem:[#allocation2 + $0x68] sm:$0xff] %v563_v44  ;;  %v540_v55 = vmax.f32 %v512_v42, %v514_v45  ;;  %v548_v15 = vmax.f32 %v528_v47, %v530_v51  ;;  %v405_v3 = vadd.f32 %v1345_v37, %v404_v52 }
 0x147   : > { %770 = vst [vmem:[%s1406_s25 + $0x8] sm:$0xff] %v762_v46  ;;  %v406_v22 = vpop.f32.mrf.mxu0  ;;  %v486_v23 = vpop.f32.mrf.mxu1  ;;  %v485_v38 = vadd.f32 %v1345_v37, %v484_v50 }
 0x148   : > { %v556_v57 = vmax.f32 %v540_v55, %v510_v48  ;;  %v564_v59 = vmax.f32 %v548_v15, %v526_v49  ;;  %v515_v12 = vmax.f32 %v405_v3, 0.0  ;;  %v666_v3 = vand.u32 7, %v636_v63 }
 0x149   : > { %v409_v61 = vpop.f32.mrf.mxu0  ;;  %v489_v62 = vpop.f32.mrf.mxu1  ;;  %v531_v13 = vmax.f32 %v485_v38, 0.0  ;;  %v595_v38 = vld [vmem:[#allocation2 + $0x58] ss:$2 sm:$0xff] }
 0x14a   : > { %573 = vst [vmem:[#allocation2 + $0x30] sm:$0xff] %v556_v57  ;;  %581 = vst [vmem:[#allocation2 + $0x70] sm:$0xff] %v564_v59  ;;  %v410_v34 = vadd.f32 %v1345_v37, %v409_v61  ;;  %v490_v24 = vadd.f32 %v1345_v37, %v489_v62  ;;  %vm1506_vm5 = vcmp.eq.s32.totalorder %v666_v3, 0 }
 0x14b   : > { %v411_v48 = vpop.f32.mrf.mxu0  ;;  %v491_v4 = vpop.f32.mrf.mxu1 }
 0x14c   : > { %v516_v21 = vmax.f32 %v410_v34, 0.0  ;;  %v532_v15 = vmax.f32 %v490_v24, 0.0  ;;  %v611_v48 = vld [vmem:[#allocation2 + $0x59] ss:$2 sm:$0xff]  ;;  %v673_v4 = vand.u32 7, %v637_v54 }
 0x14d   : > { %v414_v40 = vpop.f32.mrf.mxu0  ;;  %v494_v49 = vpop.f32.mrf.mxu1 }
 0x14e   : > { %v415_v39 = vadd.f32 %v1345_v37, %v414_v40  ;;  %v495_v60 = vadd.f32 %v1345_v37, %v494_v49  ;;  %vm1510_vm6 = vcmp.eq.s32.totalorder %v673_v4, 0 }
 0x14f   : > { %v416_v17 = vpop.f32.mrf.mxu0  ;;  %v496_v20 = vpop.f32.mrf.mxu1 }
 0x150   : > { %v517_v25 = vmax.f32 %v415_v39, 0.0  ;;  %v533_v26 = vmax.f32 %v495_v60, 0.0 }
 0x151   : > { %v589_v28 = vld [vmem:[#allocation2 + $0x28] ss:$2 sm:$0xff]  ;;  %v605_v29 = vld [vmem:[#allocation2 + $0x29] ss:$2 sm:$0xff]  ;;  %v419_v33 = vpop.f32.mrf.mxu0  ;;  %v499_v35 = vpop.f32.mrf.mxu1 }
 0x152   : > { %v621_v32 = vld [vmem:[#allocation2 + $0x27] ss:$2 sm:$0xff]  ;;  %v755_v16 = vmax.f32 %v589_v28, %v605_v29  ;;  %v597_v41 = vld [vmem:[#allocation2 + $0x68] ss:$2 sm:$0xff]  ;;  %v541_v43 = vmax.f32 %v515_v12, %v517_v25  ;;  %v559_v44 = vmax.f32 %v543_v11, %v517_v25  ;;  %v549_v52 = vmax.f32 %v531_v13, %v533_v26 }
 0x153   : > { %v747_v6 = vsel %vm1471_vm2, 0.0, %v621_v32  ;;  %v613_v42 = vld [vmem:[#allocation2 + $0x69] ss:$2 sm:$0xff]  ;;  %v420_v36 = vadd.f32 %v1345_v37, %v419_v33  ;;  %v500_v53 = vadd.f32 %v1345_v37, %v499_v35  ;;  %v421_v50 = vpop.f32.mrf.mxu0  ;;  %v501_v55 = vpop.f32.mrf.mxu1  ;;  %v638_v37 = vadd.s32 40, %v1361_v0 }
 0x154   : > { %v629_v46 = vld [vmem:[#allocation2 + $0x67] ss:$2 sm:$0xff]  ;;  %v759_v47 = vmax.f32 %v597_v41, %v613_v42  ;;  %v763_v56 = vmax.f32 %v755_v16, %v747_v6  ;;  %v557_v22 = vmax.f32 %v541_v43, %v513_v18  ;;  %576 = vst [vmem:[#allocation2 + $0x48] sm:$0xff] %v559_v44  ;;  %v565_v57 = vmax.f32 %v549_v52, %v529_v19 }
 0x155   : > { %v751_v14 = vsel %vm1475_vm3, 0.0, %v629_v46  ;;  %v518_v58 = vmax.f32 %v420_v36, 0.0  ;;  %v534_v59 = vmax.f32 %v500_v53, 0.0  ;;  %v640_v19 = vadd.s32 56, %v1361_v0 }
 0x156   : > { %v767_v23 = vmax.f32 %v759_v47, %v751_v14  ;;  %771 = vst [vmem:[%s1406_s25 + $0x10] sm:$0xff] %v763_v56  ;;  %574 = vst [vmem:[#allocation2 + $0x38] sm:$0xff] %v557_v22  ;;  %v680_v2 = vand.u32 7, %v638_v37 }
 0x157   : > { %582 = vst [vmem:[#allocation2 + $0x78] sm:$0xff] %v565_v57  ;;  %v542_v61 = vmax.f32 %v516_v21, %v518_v58  ;;  %v560_v62 = vmax.f32 %v544_v27, %v518_v58  ;;  %v550_v1 = vmax.f32 %v532_v15, %v534_v59  ;;  %v694_v34 = vand.u32 7, %v640_v19 }
 0x158   : > { %775 = vst [vmem:[%s1406_s25 + $0x30] sm:$0xff] %v767_v23  ;;  %vm742_vm4 = vcmp.eq.s32.totalorder %v680_v2, 0 }
 0x159   : > { %v558_v9 = vmax.f32 %v542_v61, %v514_v45  ;;  %577 = vst [vmem:[#allocation2 + $0x50] sm:$0xff] %v560_v62  ;;  %v566_v18 = vmax.f32 %v550_v1, %v530_v51  ;;  %v758_v45 = vmax.f32 %v595_v38, %v611_v48  ;;  %vm1514_vm7 = vcmp.eq.s32.totalorder %v694_v34, 0 }
 0x15b   : > { %575 = vst [vmem:[#allocation2 + $0x40] sm:$0xff] %v558_v9  ;;  %583 = vst [vmem:[#allocation2 + $0x80] sm:$0xff] %v566_v18 }
 0x160   : > { %v593_v5 = vld [vmem:[#allocation2 + $0x48] ss:$2 sm:$0xff]  ;;  %v609_v31 = vld [vmem:[#allocation2 + $0x49] ss:$2 sm:$0xff] }
 0x161   : > { %v627_v51 = vld [vmem:[#allocation2 + $0x57] ss:$2 sm:$0xff]  ;;  %v757_v49 = vmax.f32 %v593_v5, %v609_v31 }
 0x162   : > { %v750_v40 = vsel %vm742_vm4, 0.0, %v627_v51  ;;  %v591_v8 = vld [vmem:[#allocation2 + $0x38] ss:$2 sm:$0xff]  ;;  %v607_v39 = vld [vmem:[#allocation2 + $0x39] ss:$2 sm:$0xff] }
 0x163   : > { %v623_v60 = vld [vmem:[#allocation2 + $0x37] ss:$2 sm:$0xff]  ;;  %v766_v10 = vmax.f32 %v758_v45, %v750_v40  ;;  %v625_v11 = vld [vmem:[#allocation2 + $0x47] ss:$2 sm:$0xff]  ;;  %v756_v13 = vmax.f32 %v591_v8, %v607_v39  ;;  %v599_v17 = vld [vmem:[#allocation2 + $0x78] ss:$2 sm:$0xff] }
 0x164   : > { %v748_v12 = vsel %vm1506_vm5, 0.0, %v623_v60  ;;  %v749_v20 = vsel %vm1510_vm6, 0.0, %v625_v11  ;;  %v615_v21 = vld [vmem:[#allocation2 + $0x79] ss:$2 sm:$0xff] }
 0x165   : > { %774 = vst [vmem:[%s1406_s25 + $0x28] sm:$0xff] %v766_v10  ;;  %v631_v24 = vld [vmem:[#allocation2 + $0x77] ss:$2 sm:$0xff]  ;;  %v764_v25 = vmax.f32 %v756_v13, %v748_v12  ;;  %v765_v26 = vmax.f32 %v757_v49, %v749_v20  ;;  %v760_v28 = vmax.f32 %v599_v17, %v615_v21 }
 0x166   : > { %v752_v27 = vsel %vm1514_vm7, 0.0, %v631_v24 }
 0x167   : > { %772 = vst [vmem:[%s1406_s25 + $0x18] sm:$0xff] %v764_v25  ;;  %773 = vst [vmem:[%s1406_s25 + $0x20] sm:$0xff] %v765_v26  ;;  %v768_v29 = vmax.f32 %v760_v28, %v752_v27 }
 0x169   : > { %776 = vst [vmem:[%s1406_s25 + $0x38] sm:$0xff] %v768_v29 }
 0x16a   : > { %988 = shalt.err (!%p985_p3)
}
 0x16b   : > { %s989_s8 = scalar_lea.hbm %s1530_s29, 1024  ;;  %s993_s11 = scalar_lea.hbm %s1582_s3, 2048 }
 0x16c   : > { %p990_p4 = scmp.ne.s32.totalorder %s1530_s29, %s989_s8  ;;  %p994_p9 = scmp.lt.s32.totalorder %s1530_s29, %s1582_s3 }
 0x16d   : > { %p995_p10 = scmp.lt.s32.totalorder %s993_s11, %s989_s8 }
 0x16e   : > { %p991_p7 = pnand %p990_p4, %p1099_p5 }
 0x16f   : > { %p996_p11 = por %p995_p10, %p994_p9 }
 0x170   : > { %p992_p8 = pneg %p991_p7 }
 0x172   : > { %p997_p12 = pnand %p996_p11, %p992_p8 }
 0x174   : > { %1000 = shalt.err (!%p997_p12)
}
 0x175   : > { %s1039_s20 = smov 128   ;;  %s1040_s24 = smov 8  }
 0x176   : > { %933 = dma.vmem_to_hbm [thread:$0]  (%p1099_p5), %s1532_s27, 1024, %s1530_s29, %s1539_s30, %s1039_s20, %s1039_s20, %s1040_s24  }
 0x177 PF: > { %p939_p13 = scmp.ge.s32.totalorder %s1035_s15, 2  ;;  %s806_s25 = sand.u32 1, %s1023_s12  }
 0x178   : > { %s807_s26 = scalar_lea.sflag [#allocation4], %s806_s25 }
 0x179   : > { %p936_p0 = pnand %p939_p13, %p1103_p6 }
 0x17b   : > { %p937_p1 = pneg %p936_p0 }
 0x17d   : > { %1018 = dma.done.wait (%p937_p1), %s807_s26, 1024  }
 0x17e   : > { %1020 = vsyncadd (%p937_p1), %s807_s26, 4294966272  ;;  %p13_p2 = scmp.ge.s32.totalorder %s1086_s18, 4   ;;  %s1599_s12 = smov %s1027_s13 }
 0x17f   : > { %s1600_s13 = smov %s1031_s14  ;;  %s1601_s14 = smov %s1097_s21 }
 0x180   : > { %s1602_s15 = smov %s1086_s18  ;;  %15 = sbr.rel (!%p13_p2) target bundleno = 3 (0x3), region = 91 }
 0x185   :  { %812 = vsyncpa [#allocation4], 1 }
 0x186   :  { %814 = vsyncpa [#allocation4 + $0x1], 1 }

</bundles_post_ra>
